<compile_context>
chip_gen: v6e
topology: v6e:2x2x1
jax: 0.10.0
libtpu: 0.0.40
codegen_flags: <defaults>
</compile_context>

<pallas_src>
import math
import functools

import jax
import jax.numpy as jnp
from jax import lax
from jax.experimental import pallas as pl
from jax.experimental.pallas import tpu as pltpu

# ---- model config (small, deterministic) -----------------------------------
HIDDEN_SIZE = 32
NUM_HEADS = 4
HEAD_SIZE = HIDDEN_SIZE // NUM_HEADS   # 8
DROPOUT_P = 0.1
# TODO(synk): nn.Dropout on attention_probs is only active in training mode;
# this kernel implements eval-mode (identity) dropout.


def _mha_kernel(*refs, bb, seq_q, seq_kv, num_heads, head_size,
                self_attn, has_mask):
    H = num_heads * head_size
    it = iter(refs)

    x_ref = next(it)                               # (bb, Sq, H)
    kv_ref = None if self_attn else next(it)       # (bb, Skv, H)
    mask_ref = next(it) if has_mask else None      # (bb, 1, Sq, Skv)
    if self_attn:
        wqkv_ref, bqkv_ref = next(it), next(it)    # (H, 3H), (1, 3H)
    else:
        wq_ref, bq_ref = next(it), next(it)        # (H, H), (1, H)
        wkv_ref, bkv_ref = next(it), next(it)      # (H, 2H), (1, 2H)
    wo_ref, bo_ref = next(it), next(it)            # (H, H), (1, H)
    out_ref = next(it)                             # (bb, Sq, H)

    x = x_ref[...].reshape(bb * seq_q, H)

    # Projections: weights are already (in, out) with 1/sqrt(hd) folded into Wq,
    # so no in-kernel transposes and no per-scores scaling.
    if self_attn:
        qkv = jnp.dot(x, wqkv_ref[...],
                      preferred_element_type=jnp.float32) + bqkv_ref[...]
        q = qkv[:, 0:H]
        k = qkv[:, H:2 * H]
        v = qkv[:, 2 * H:3 * H]
    else:
        kvx = kv_ref[...].reshape(bb * seq_kv, H)
        q = jnp.dot(x, wq_ref[...],
                    preferred_element_type=jnp.float32) + bq_ref[...]
        kvp = jnp.dot(kvx, wkv_ref[...],
                      preferred_element_type=jnp.float32) + bkv_ref[...]
        k = kvp[:, 0:H]
        v = kvp[:, H:2 * H]

    wo = wo_ref[...]                               # (H, H) in (in, out) layout
    bo = bo_ref[...]                               # (1, H)

    # Per-batch-element, per-head attention (static, fully unrolled: bb*nh tiny).
    # The output projection is accumulated per head so no context slab is ever
    # materialized in VMEM.
    for b in range(bb):
        qb = q[b * seq_q:(b + 1) * seq_q, :]
        kb = k[b * seq_kv:(b + 1) * seq_kv, :]
        vb = v[b * seq_kv:(b + 1) * seq_kv, :]
        mb = mask_ref[b, 0] if has_mask else None      # (Sq, Skv)

        acc = jnp.zeros((seq_q, H), jnp.float32)       # register accumulator
        for h in range(num_heads):
            lo = h * head_size
            hi = lo + head_size
            qh = qb[:, lo:hi]                          # (Sq, hd) (already scaled)
            kh = kb[:, lo:hi]                          # (Skv, hd)
            vh = vb[:, lo:hi]                          # (Skv, hd)

            # scores = qh @ kh^T without an explicit transpose (contract last dims)
            s = lax.dot_general(qh, kh, (((1,), (1,)), ((), ())),
                                preferred_element_type=jnp.float32)
            if has_mask:
                s = s + mb

            # numerically-stable softmax; divide goes to the EUP (approx recip)
            s = s - jnp.max(s, axis=-1, keepdims=True)
            p = jnp.exp(s)
            p = p * pl.reciprocal(jnp.sum(p, axis=-1, keepdims=True), approx=True)

            ctx_h = jnp.dot(p, vh, preferred_element_type=jnp.float32)  # (Sq, hd)
            # Fused output projection: ctx @ Wo == sum_h ctx_h @ Wo[lo:hi, :].
            # wo[lo:hi, :] is a sublane-aligned slice (hd == 8 rows).
            acc = acc + jnp.dot(ctx_h, wo[lo:hi, :],
                                preferred_element_type=jnp.float32)

        out_ref[b] = (acc + bo).astype(out_ref.dtype)  # single (Sq, H) store


def multi_head_attention(hidden_states, params,
                         attention_mask=None, cross_hidden_states=None):
    """hidden_states: (B, S, H) f32; attention_mask: additive, broadcastable to
    (B, 1, S, Skv); cross_hidden_states: (B, Skv, H) or None."""
    B, S, H = hidden_states.shape
    self_attn = cross_hidden_states is None
    kv = hidden_states if self_attn else cross_hidden_states
    Skv = kv.shape[1]
    has_mask = attention_mask is not None

    # --- one-time weight plumbing (wrapper-side, free per call) -------------
    scale = 1.0 / math.sqrt(HEAD_SIZE)
    wq_t = params["wq"].T * scale                       # (in, out), scale folded
    bq_s = (params["bq"] * scale).reshape(1, H)
    wk_t = params["wk"].T
    wv_t = params["wv"].T
    bk = params["bk"].reshape(1, H)
    bv = params["bv"].reshape(1, H)
    wo_t = params["wo"].T
    bo = params["bo"].reshape(1, H)

    # <=2 grid steps: 2-way parallel feeds both v7x TensorCores; on single-TC
    # v5e/v6e this caps the serial per-step pipeline overhead at one extra step.
    grid_b = 2 if (B % 2 == 0 and B >= 2) else 1
    bb = B // grid_b

    inputs = [hidden_states]
    in_specs = [pl.BlockSpec((bb, S, H), lambda i: (i, 0, 0))]
    if not self_attn:
        inputs.append(kv)
        in_specs.append(pl.BlockSpec((bb, Skv, H), lambda i: (i, 0, 0)))
    if has_mask:
        mask = jnp.broadcast_to(attention_mask, (B, 1, S, Skv)).astype(jnp.float32)
        inputs.append(mask)
        in_specs.append(pl.BlockSpec((bb, 1, S, Skv), lambda i: (i, 0, 0, 0)))

    def rep(arr):   # replicated (weight) operand: full block, same every step
        inputs.append(arr)
        in_specs.append(
            pl.BlockSpec(arr.shape, lambda i, _n=arr.ndim: (0,) * _n))

    if self_attn:
        rep(jnp.concatenate([wq_t, wk_t, wv_t], axis=1))   # fused QKV (H, 3H)
        rep(jnp.concatenate([bq_s, bk, bv], axis=1))       # fused bias (1, 3H)
    else:
        rep(wq_t)
        rep(bq_s)
        rep(jnp.concatenate([wk_t, wv_t], axis=1))          # fused KV (H, 2H)
        rep(jnp.concatenate([bk, bv], axis=1))               # fused bias (1, 2H)
    rep(wo_t)
    rep(bo)

    kernel = functools.partial(
        _mha_kernel, bb=bb, seq_q=S, seq_kv=Skv,
        num_heads=NUM_HEADS, head_size=HEAD_SIZE,
        self_attn=self_attn, has_mask=has_mask)

    return pl.pallas_call(
        kernel,
        out_shape=jax.ShapeDtypeStruct((B, S, H), hidden_states.dtype),
        grid_spec=pltpu.PrefetchScalarGridSpec(
            num_scalar_prefetch=0,
            grid=(grid_b,),
            in_specs=in_specs,
            out_specs=pl.BlockSpec((bb, S, H), lambda i: (i, 0, 0)),
        ),
        compiler_params=pltpu.CompilerParams(dimension_semantics=("parallel",)),
    )(*inputs)


# ---- pure-JAX reference (mirrors the PyTorch forward) -----------------------
def _reference(hidden_states, params, attention_mask=None, cross_hidden_states=None):
    B, S, H = hidden_states.shape
    kv = hidden_states if cross_hidden_states is None else cross_hidden_states

    def lin(x, w, b):
        return x @ w.T + b

    q = lin(hidden_states, params["wq"], params["bq"])
    k = lin(kv, params["wk"], params["bk"])
    v = lin(kv, params["wv"], params["bv"])

    def split(x):
        b, s, _ = x.shape
        return x.reshape(b, s, NUM_HEADS, HEAD_SIZE).transpose(0, 2, 1, 3)

    qh, kh, vh = split(q), split(k), split(v)
    scores = jnp.einsum("bhqd,bhkd->bhqk", qh, kh) / math.sqrt(HEAD_SIZE)
    if attention_mask is not None:
        scores = scores + attention_mask
    probs = jax.nn.softmax(scores, axis=-1)
    ctx = jnp.einsum("bhqk,bhkd->bhqd", probs, vh)
    ctx = ctx.transpose(0, 2, 1, 3).reshape(B, S, H)
    return lin(ctx, params["wo"], params["bo"])


def _init_params(key, hidden):
    ks = jax.random.split(key, 8)
    bound = 1.0 / math.sqrt(hidden)
    def w(k): return jax.random.uniform(k, (hidden, hidden), jnp.float32, -bound, bound)
    def b(k): return jax.random.uniform(k, (hidden,), jnp.float32, -bound, bound)
    return {
        "wq": w(ks[0]), "bq": b(ks[1]),
        "wk": w(ks[2]), "bk": b(ks[3]),
        "wv": w(ks[4]), "bv": b(ks[5]),
        "wo": w(ks[6]), "bo": b(ks[7]),
    }


if __name__ == "__main__":
    key = jax.random.PRNGKey(0)
    kp, kx, kc, km = jax.random.split(key, 4)

    B, S, Skv = 2, 8, 16
    params = _init_params(kp, HIDDEN_SIZE)

    x = jax.random.normal(kx, (B, S, HIDDEN_SIZE), jnp.float32)
    cross = jax.random.normal(kc, (B, Skv, HIDDEN_SIZE), jnp.float32)
    # additive mask (0 / -10000 padding mask), broadcastable over heads
    mask_self = jnp.where(
        jax.random.bernoulli(km, 0.8, (B, 1, S, S)), 0.0, -10000.0
    ).astype(jnp.float32)

    # self-attention with mask (fused-QKV + mask path)
    out_self = jax.block_until_ready(
        multi_head_attention(x, params, attention_mask=mask_self))
    ref_self = _reference(x, params, attention_mask=mask_self)

    # cross-attention, no mask (Q + fused-KV, mask-free specialization)
    out_cross = jax.block_until_ready(
        multi_head_attention(x, params, cross_hidden_states=cross))
    ref_cross = _reference(x, params, cross_hidden_states=cross)

    # Tolerance is loosened vs exact-divide because the softmax denominator
    # uses the EUP approximate reciprocal (pl.reciprocal(..., approx=True)).
    assert jnp.allclose(out_self, ref_self, atol=1e-2, rtol=1e-2)
    assert jnp.allclose(out_cross, ref_cross, atol=1e-2, rtol=1e-2)
    print("KERNEL_OK")
</pallas_src>

<mosaic_0001>
module attributes {stable_mosaic.version = 11 : i64} {
  func.func @_mha_kernel(%arg0: i32, %arg1: memref<1x8x32xf32, #tpu.memory_space<vmem>>, %arg2: memref<1x1x8x8xf32, #tpu.memory_space<vmem>>, %arg3: memref<32x96xf32, #tpu.memory_space<vmem>>, %arg4: memref<1x96xf32, #tpu.memory_space<vmem>>, %arg5: memref<32x32xf32, #tpu.memory_space<vmem>>, %arg6: memref<1x32xf32, #tpu.memory_space<vmem>>, %arg7: memref<1x8x32xf32, #tpu.memory_space<vmem>>) attributes {dimension_semantics = [#tpu.dimension_semantics<parallel>], iteration_bounds = array<i64: 2>, scalar_prefetch = 0 : i64, scratch_operands = 0 : i64, tpu.core_type = #tpu.core_type<tc>, window_params = [{transform_indices = @transform_0, window_bounds = array<i64: 1, 8, 32>}, {transform_indices = @transform_1, window_bounds = array<i64: 1, 1, 8, 8>}, {pipeline_mode = #tpu.pipeline_mode<synchronous>, transform_indices = @transform_2, window_bounds = array<i64: 32, 96>}, {pipeline_mode = #tpu.pipeline_mode<synchronous>, transform_indices = @transform_3, window_bounds = array<i64: 1, 96>}, {pipeline_mode = #tpu.pipeline_mode<synchronous>, transform_indices = @transform_4, window_bounds = array<i64: 32, 32>}, {pipeline_mode = #tpu.pipeline_mode<synchronous>, transform_indices = @transform_5, window_bounds = array<i64: 1, 32>}, {transform_indices = @transform_6, window_bounds = array<i64: 1, 8, 32>}]} {
    %c0 = arith.constant 0 : index
    %c0_0 = arith.constant 0 : index
    %c0_1 = arith.constant 0 : index
    %0 = vector.load %arg1[%c0, %c0_0, %c0_1] : memref<1x8x32xf32, #tpu.memory_space<vmem>>, vector<1x8x32xf32>
    %1 = vector.shape_cast %0 : vector<1x8x32xf32> to vector<8x32xf32>
    %c0_2 = arith.constant 0 : index
    %c0_3 = arith.constant 0 : index
    %2 = vector.load %arg3[%c0_2, %c0_3] : memref<32x96xf32, #tpu.memory_space<vmem>>, vector<32x96xf32>
    %cst = arith.constant dense<0.000000e+00> : vector<8x96xf32>
    %3 = tpu.matmul %1, %2, %cst {dimension_numbers = #tpu.dot_dimension_numbers<[1], [0], [0], [1], [0, 0, 1, 1], [], []>} : vector<8x32xf32>, vector<32x96xf32>, vector<8x96xf32> -> vector<8x96xf32>
    %c0_4 = arith.constant 0 : index
    %c0_5 = arith.constant 0 : index
    %4 = vector.load %arg4[%c0_4, %c0_5] : memref<1x96xf32, #tpu.memory_space<vmem>>, vector<1x96xf32>
    %5 = vector.broadcast %4 : vector<1x96xf32> to vector<8x96xf32>
    %6 = arith.addf %3, %5 : vector<8x96xf32>
    %7 = vector.extract_strided_slice %6 {offsets = [0, 0], sizes = [8, 32], strides = [1, 1]} : vector<8x96xf32> to vector<8x32xf32>
    %8 = vector.extract_strided_slice %6 {offsets = [0, 32], sizes = [8, 32], strides = [1, 1]} : vector<8x96xf32> to vector<8x32xf32>
    %9 = vector.extract_strided_slice %6 {offsets = [0, 64], sizes = [8, 32], strides = [1, 1]} : vector<8x96xf32> to vector<8x32xf32>
    %c0_6 = arith.constant 0 : index
    %c0_7 = arith.constant 0 : index
    %10 = vector.load %arg5[%c0_6, %c0_7] : memref<32x32xf32, #tpu.memory_space<vmem>>, vector<32x32xf32>
    %c0_8 = arith.constant 0 : index
    %c0_9 = arith.constant 0 : index
    %11 = vector.load %arg6[%c0_8, %c0_9] : memref<1x32xf32, #tpu.memory_space<vmem>>, vector<1x32xf32>
    %c0_10 = arith.constant 0 : index
    %c0_11 = arith.constant 0 : index
    %c0_12 = arith.constant 0 : index
    %c0_13 = arith.constant 0 : index
    %12 = vector.load %arg2[%c0_10, %c0_11, %c0_12, %c0_13] : memref<1x1x8x8xf32, #tpu.memory_space<vmem>>, vector<1x1x8x8xf32>
    %13 = vector.shape_cast %12 : vector<1x1x8x8xf32> to vector<8x8xf32>
    %cst_14 = arith.constant 0.000000e+00 : f32
    %14 = vector.broadcast %cst_14 : f32 to vector<8x32xf32>
    %15 = vector.extract_strided_slice %7 {offsets = [0, 0], sizes = [8, 8], strides = [1, 1]} : vector<8x32xf32> to vector<8x8xf32>
    %16 = vector.extract_strided_slice %8 {offsets = [0, 0], sizes = [8, 8], strides = [1, 1]} : vector<8x32xf32> to vector<8x8xf32>
    %17 = vector.extract_strided_slice %9 {offsets = [0, 0], sizes = [8, 8], strides = [1, 1]} : vector<8x32xf32> to vector<8x8xf32>
    %cst_15 = arith.constant dense<0.000000e+00> : vector<8x8xf32>
    %18 = tpu.matmul %15, %16, %cst_15 {dimension_numbers = #tpu.dot_dimension_numbers<[1], [1], [0], [0], [0, 0, 1, 0], [], []>} : vector<8x8xf32>, vector<8x8xf32>, vector<8x8xf32> -> vector<8x8xf32>
    %19 = arith.addf %18, %13 : vector<8x8xf32>
    %cst_16 = arith.constant dense<0xFF800000> : vector<8xf32>
    %20 = vector.multi_reduction <maximumf>, %19, %cst_16 [1] : vector<8x8xf32> to vector<8xf32>
    %21 = vector.shape_cast %20 : vector<8xf32> to vector<8x1xf32>
    %22 = vector.broadcast %21 : vector<8x1xf32> to vector<8x8xf32>
    %23 = arith.subf %19, %22 : vector<8x8xf32>
    %24 = math.exp %23 : vector<8x8xf32>
    %cst_17 = arith.constant dense<0.000000e+00> : vector<8xf32>
    %25 = vector.multi_reduction <add>, %24, %cst_17 [1] : vector<8x8xf32> to vector<8xf32>
    %26 = vector.shape_cast %25 : vector<8xf32> to vector<8x1xf32>
    %27 = tpu.reciprocal %26 {approx = true} : vector<8x1xf32> -> vector<8x1xf32>
    %28 = vector.broadcast %27 : vector<8x1xf32> to vector<8x8xf32>
    %29 = arith.mulf %24, %28 : vector<8x8xf32>
    %cst_18 = arith.constant dense<0.000000e+00> : vector<8x8xf32>
    %30 = tpu.matmul %29, %17, %cst_18 {dimension_numbers = #tpu.dot_dimension_numbers<[1], [0], [0], [1], [0, 0, 1, 1], [], []>} : vector<8x8xf32>, vector<8x8xf32>, vector<8x8xf32> -> vector<8x8xf32>
    %31 = vector.extract_strided_slice %10 {offsets = [0, 0], sizes = [8, 32], strides = [1, 1]} : vector<32x32xf32> to vector<8x32xf32>
    %cst_19 = arith.constant dense<0.000000e+00> : vector<8x32xf32>
    %32 = tpu.matmul %30, %31, %cst_19 {dimension_numbers = #tpu.dot_dimension_numbers<[1], [0], [0], [1], [0, 0, 1, 1], [], []>} : vector<8x8xf32>, vector<8x32xf32>, vector<8x32xf32> -> vector<8x32xf32>
    %33 = arith.addf %14, %32 : vector<8x32xf32>
    %34 = vector.extract_strided_slice %7 {offsets = [0, 8], sizes = [8, 8], strides = [1, 1]} : vector<8x32xf32> to vector<8x8xf32>
    %35 = vector.extract_strided_slice %8 {offsets = [0, 8], sizes = [8, 8], strides = [1, 1]} : vector<8x32xf32> to vector<8x8xf32>
    %36 = vector.extract_strided_slice %9 {offsets = [0, 8], sizes = [8, 8], strides = [1, 1]} : vector<8x32xf32> to vector<8x8xf32>
    %cst_20 = arith.constant dense<0.000000e+00> : vector<8x8xf32>
    %37 = tpu.matmul %34, %35, %cst_20 {dimension_numbers = #tpu.dot_dimension_numbers<[1], [1], [0], [0], [0, 0, 1, 0], [], []>} : vector<8x8xf32>, vector<8x8xf32>, vector<8x8xf32> -> vector<8x8xf32>
    %38 = arith.addf %37, %13 : vector<8x8xf32>
    %cst_21 = arith.constant dense<0xFF800000> : vector<8xf32>
    %39 = vector.multi_reduction <maximumf>, %38, %cst_21 [1] : vector<8x8xf32> to vector<8xf32>
    %40 = vector.shape_cast %39 : vector<8xf32> to vector<8x1xf32>
    %41 = vector.broadcast %40 : vector<8x1xf32> to vector<8x8xf32>
    %42 = arith.subf %38, %41 : vector<8x8xf32>
    %43 = math.exp %42 : vector<8x8xf32>
    %cst_22 = arith.constant dense<0.000000e+00> : vector<8xf32>
    %44 = vector.multi_reduction <add>, %43, %cst_22 [1] : vector<8x8xf32> to vector<8xf32>
    %45 = vector.shape_cast %44 : vector<8xf32> to vector<8x1xf32>
    %46 = tpu.reciprocal %45 {approx = true} : vector<8x1xf32> -> vector<8x1xf32>
    %47 = vector.broadcast %46 : vector<8x1xf32> to vector<8x8xf32>
    %48 = arith.mulf %43, %47 : vector<8x8xf32>
    %cst_23 = arith.constant dense<0.000000e+00> : vector<8x8xf32>
    %49 = tpu.matmul %48, %36, %cst_23 {dimension_numbers = #tpu.dot_dimension_numbers<[1], [0], [0], [1], [0, 0, 1, 1], [], []>} : vector<8x8xf32>, vector<8x8xf32>, vector<8x8xf32> -> vector<8x8xf32>
    %50 = vector.extract_strided_slice %10 {offsets = [8, 0], sizes = [8, 32], strides = [1, 1]} : vector<32x32xf32> to vector<8x32xf32>
    %cst_24 = arith.constant dense<0.000000e+00> : vector<8x32xf32>
    %51 = tpu.matmul %49, %50, %cst_24 {dimension_numbers = #tpu.dot_dimension_numbers<[1], [0], [0], [1], [0, 0, 1, 1], [], []>} : vector<8x8xf32>, vector<8x32xf32>, vector<8x32xf32> -> vector<8x32xf32>
    %52 = arith.addf %33, %51 : vector<8x32xf32>
    %53 = vector.extract_strided_slice %7 {offsets = [0, 16], sizes = [8, 8], strides = [1, 1]} : vector<8x32xf32> to vector<8x8xf32>
    %54 = vector.extract_strided_slice %8 {offsets = [0, 16], sizes = [8, 8], strides = [1, 1]} : vector<8x32xf32> to vector<8x8xf32>
    %55 = vector.extract_strided_slice %9 {offsets = [0, 16], sizes = [8, 8], strides = [1, 1]} : vector<8x32xf32> to vector<8x8xf32>
    %cst_25 = arith.constant dense<0.000000e+00> : vector<8x8xf32>
    %56 = tpu.matmul %53, %54, %cst_25 {dimension_numbers = #tpu.dot_dimension_numbers<[1], [1], [0], [0], [0, 0, 1, 0], [], []>} : vector<8x8xf32>, vector<8x8xf32>, vector<8x8xf32> -> vector<8x8xf32>
    %57 = arith.addf %56, %13 : vector<8x8xf32>
    %cst_26 = arith.constant dense<0xFF800000> : vector<8xf32>
    %58 = vector.multi_reduction <maximumf>, %57, %cst_26 [1] : vector<8x8xf32> to vector<8xf32>
    %59 = vector.shape_cast %58 : vector<8xf32> to vector<8x1xf32>
    %60 = vector.broadcast %59 : vector<8x1xf32> to vector<8x8xf32>
    %61 = arith.subf %57, %60 : vector<8x8xf32>
    %62 = math.exp %61 : vector<8x8xf32>
    %cst_27 = arith.constant dense<0.000000e+00> : vector<8xf32>
    %63 = vector.multi_reduction <add>, %62, %cst_27 [1] : vector<8x8xf32> to vector<8xf32>
    %64 = vector.shape_cast %63 : vector<8xf32> to vector<8x1xf32>
    %65 = tpu.reciprocal %64 {approx = true} : vector<8x1xf32> -> vector<8x1xf32>
    %66 = vector.broadcast %65 : vector<8x1xf32> to vector<8x8xf32>
    %67 = arith.mulf %62, %66 : vector<8x8xf32>
    %cst_28 = arith.constant dense<0.000000e+00> : vector<8x8xf32>
    %68 = tpu.matmul %67, %55, %cst_28 {dimension_numbers = #tpu.dot_dimension_numbers<[1], [0], [0], [1], [0, 0, 1, 1], [], []>} : vector<8x8xf32>, vector<8x8xf32>, vector<8x8xf32> -> vector<8x8xf32>
    %69 = vector.extract_strided_slice %10 {offsets = [16, 0], sizes = [8, 32], strides = [1, 1]} : vector<32x32xf32> to vector<8x32xf32>
    %cst_29 = arith.constant dense<0.000000e+00> : vector<8x32xf32>
    %70 = tpu.matmul %68, %69, %cst_29 {dimension_numbers = #tpu.dot_dimension_numbers<[1], [0], [0], [1], [0, 0, 1, 1], [], []>} : vector<8x8xf32>, vector<8x32xf32>, vector<8x32xf32> -> vector<8x32xf32>
    %71 = arith.addf %52, %70 : vector<8x32xf32>
    %72 = vector.extract_strided_slice %7 {offsets = [0, 24], sizes = [8, 8], strides = [1, 1]} : vector<8x32xf32> to vector<8x8xf32>
    %73 = vector.extract_strided_slice %8 {offsets = [0, 24], sizes = [8, 8], strides = [1, 1]} : vector<8x32xf32> to vector<8x8xf32>
    %74 = vector.extract_strided_slice %9 {offsets = [0, 24], sizes = [8, 8], strides = [1, 1]} : vector<8x32xf32> to vector<8x8xf32>
    %cst_30 = arith.constant dense<0.000000e+00> : vector<8x8xf32>
    %75 = tpu.matmul %72, %73, %cst_30 {dimension_numbers = #tpu.dot_dimension_numbers<[1], [1], [0], [0], [0, 0, 1, 0], [], []>} : vector<8x8xf32>, vector<8x8xf32>, vector<8x8xf32> -> vector<8x8xf32>
    %76 = arith.addf %75, %13 : vector<8x8xf32>
    %cst_31 = arith.constant dense<0xFF800000> : vector<8xf32>
    %77 = vector.multi_reduction <maximumf>, %76, %cst_31 [1] : vector<8x8xf32> to vector<8xf32>
    %78 = vector.shape_cast %77 : vector<8xf32> to vector<8x1xf32>
    %79 = vector.broadcast %78 : vector<8x1xf32> to vector<8x8xf32>
    %80 = arith.subf %76, %79 : vector<8x8xf32>
    %81 = math.exp %80 : vector<8x8xf32>
    %cst_32 = arith.constant dense<0.000000e+00> : vector<8xf32>
    %82 = vector.multi_reduction <add>, %81, %cst_32 [1] : vector<8x8xf32> to vector<8xf32>
    %83 = vector.shape_cast %82 : vector<8xf32> to vector<8x1xf32>
    %84 = tpu.reciprocal %83 {approx = true} : vector<8x1xf32> -> vector<8x1xf32>
    %85 = vector.broadcast %84 : vector<8x1xf32> to vector<8x8xf32>
    %86 = arith.mulf %81, %85 : vector<8x8xf32>
    %cst_33 = arith.constant dense<0.000000e+00> : vector<8x8xf32>
    %87 = tpu.matmul %86, %74, %cst_33 {dimension_numbers = #tpu.dot_dimension_numbers<[1], [0], [0], [1], [0, 0, 1, 1], [], []>} : vector<8x8xf32>, vector<8x8xf32>, vector<8x8xf32> -> vector<8x8xf32>
    %88 = vector.extract_strided_slice %10 {offsets = [24, 0], sizes = [8, 32], strides = [1, 1]} : vector<32x32xf32> to vector<8x32xf32>
    %cst_34 = arith.constant dense<0.000000e+00> : vector<8x32xf32>
    %89 = tpu.matmul %87, %88, %cst_34 {dimension_numbers = #tpu.dot_dimension_numbers<[1], [0], [0], [1], [0, 0, 1, 1], [], []>} : vector<8x8xf32>, vector<8x32xf32>, vector<8x32xf32> -> vector<8x32xf32>
    %90 = arith.addf %71, %89 : vector<8x32xf32>
    %91 = vector.broadcast %11 : vector<1x32xf32> to vector<8x32xf32>
    %92 = arith.addf %90, %91 : vector<8x32xf32>
    %c0_35 = arith.constant 0 : index
    %c0_36 = arith.constant 0 : index
    %c0_37 = arith.constant 0 : index
    %93 = vector.load %arg7[%c0_35, %c0_36, %c0_37] : memref<1x8x32xf32, #tpu.memory_space<vmem>>, vector<1x8x32xf32>
    %94 = vector.shape_cast %93 : vector<1x8x32xf32> to vector<8x32xf32>
    %95 = vector.shape_cast %92 : vector<8x32xf32> to vector<1x8x32xf32>
    tpu.vector_store %arg7[%c0_35, %c0_36, %c0_37], %95 {strides = array<i32>} : memref<1x8x32xf32, #tpu.memory_space<vmem>>, vector<1x8x32xf32>,
    return
  }
  func.func @transform_0(%arg0: i32) -> (i32, i32, i32) {
    %c0_i32 = arith.constant 0 : i32
    %c0_i32_0 = arith.constant 0 : i32
    %c0_i32_1 = arith.constant 0 : i32
    return %arg0, %c0_i32, %c0_i32_0 : i32, i32, i32
  }
  func.func @transform_1(%arg0: i32) -> (i32, i32, i32, i32) {
    %c0_i32 = arith.constant 0 : i32
    %c0_i32_0 = arith.constant 0 : i32
    %c0_i32_1 = arith.constant 0 : i32
    %c0_i32_2 = arith.constant 0 : i32
    return %arg0, %c0_i32, %c0_i32_0, %c0_i32_1 : i32, i32, i32, i32
  }
  func.func @transform_2(%arg0: i32) -> (i32, i32) {
    %c0_i32 = arith.constant 0 : i32
    %c0_i32_0 = arith.constant 0 : i32
    %c0_i32_1 = arith.constant 0 : i32
    return %c0_i32, %c0_i32_0 : i32, i32
  }
  func.func @transform_3(%arg0: i32) -> (i32, i32) {
    %c0_i32 = arith.constant 0 : i32
    %c0_i32_0 = arith.constant 0 : i32
    %c0_i32_1 = arith.constant 0 : i32
    return %c0_i32, %c0_i32_0 : i32, i32
  }
  func.func @transform_4(%arg0: i32) -> (i32, i32) {
    %c0_i32 = arith.constant 0 : i32
    %c0_i32_0 = arith.constant 0 : i32
    %c0_i32_1 = arith.constant 0 : i32
    return %c0_i32, %c0_i32_0 : i32, i32
  }
  func.func @transform_5(%arg0: i32) -> (i32, i32) {
    %c0_i32 = arith.constant 0 : i32
    %c0_i32_0 = arith.constant 0 : i32
    %c0_i32_1 = arith.constant 0 : i32
    return %c0_i32, %c0_i32_0 : i32, i32
  }
  func.func @transform_6(%arg0: i32) -> (i32, i32, i32) {
    %c0_i32 = arith.constant 0 : i32
    %c0_i32_0 = arith.constant 0 : i32
    %c0_i32_1 = arith.constant 0 : i32
    return %arg0, %c0_i32, %c0_i32_0 : i32, i32, i32
  }
}

</mosaic_0001>

<bundles_post_ra>
// kernel: tpu_custom_call.1
= control target key start
LH: loop header
LB: loop body
LE: loop exit
PB: predicated region body
PF: predicated region fallthrough
CT: control target
= control target key end

     0   :  { %s2312_s0 = inlined_call_operand.hbm [shape: f32[2,8,32], index: 0, kind: input, shape index: {}]   ;;  %s2313_s1 = inlined_call_operand.hbm [shape: f32[2,1,8,8], index: 1, kind: input, shape index: {}]   ;;  %s2314_s2 = inlined_call_operand.hbm [shape: f32[32,96], index: 2, kind: input, shape index: {}]   ;;  %s2315_s3 = inlined_call_operand.vmem [shape: f32[1,96], index: 3, kind: input, shape index: {}]   ;;  %s2316_s4 = inlined_call_operand.hbm [shape: f32[32,32], index: 4, kind: input, shape index: {}]   ;;  %s2317_s5 = inlined_call_operand.vmem [shape: f32[1,32], index: 5, kind: input, shape index: {}]   ;;  %s2318_s6 = inlined_call_operand.hbm [shape: f32[2,8,32], index: 6, kind: output, shape index: {}]  }
   0x1   :  { %2323 = sst [smem:[#allocation17_spill]] %s2314_s2 }
   0x2   :  { %2324 = sst [smem:[#allocation18_spill]] %s2316_s4 }
   0x3   :  { %11 = vsyncpa [#allocation3], 0 }
   0x4   :  { %13 = vsyncpa [#allocation3 + $0x1], 0 }
   0x5   :  { %14 = vsyncpa [#allocation6], 0 }
   0x6   :  { %16 = vsyncpa [#allocation6 + $0x1], 0 }
   0x7   :  { %17 = vsyncpa [#allocation9], 0 }
   0x8   :  { %18 = vsyncpa [#allocation4], 0 }
   0x9   :  { %20 = vsyncpa [#allocation4 + $0x1], 0  ;;  %s1995_s21 = smov 0   ;;  %s1997_s22 = smov 0  }
   0xa   :  { %s1999_s23 = smov 0   ;;  %s2001_s24 = smov 0  }
   0xb LB: > { %s2016_s25 = sadd.s32 4294967295, %s1938_s24   ;;  %s1513_s26 = sadd.s32 4294967294, %s1938_s24   ;;  %s1938_s24 = sphi %s2001_s24, %s2348_s24   ;;  %s1934_s23 = sphi %s1999_s23, %s2347_s23   ;;  %s1930_s22 = sphi %s1997_s22, %s2346_s22   ;;  %s1926_s21 = sphi %s1995_s21, %s2345_s21  }
   0xc   : > { %p46_p0 = scmp.ne.s32.totalorder %s1930_s22, %s1926_s21  ;;  %p2319_p1 = scmp.eq.s32.totalorder %s2016_s25, 0 }
   0xd   : > { %p186_p3 = scmp.eq.s32.totalorder %s1513_s26, 1  ;;  %p1514_p5 = scmp.ge.s32.totalorder %s1938_s24, 1 }
   0xe   : > { %p2025_p4 = por %p2319_p1, %p46_p0  ;;  %p193_p7 = scmp.lt.s32.totalorder %s1938_s24, 3 }
   0xf   : > { %p2030_p6 = por %p186_p3, %p46_p0  ;;  %s1940_s30 = smov [#allocation7]  }
  0x10   : > { %s2325_s27 = scalar_select %p2025_p4, 1, 0 }
  0x11   : > { %s2326_s28 = scalar_select %p2030_p6, 1, 0 }
  0x12   : > { %p2035_p8 = pnand %p1514_p5, %p193_p7  ;;  %s205_s7 = sshll.u32 %s1940_s30, 4  ;;  %s206_s7 = int_to_ptr.vmem [resolvable:$true] %s205_s7 }
  0x13   : > { %s1941_s9 = smov [#allocation8]   ;;  %s1765_s11 = scalar_lea.vmem %s206_s7, 512 }
  0x14   : > { %s2327_s29 = scalar_select %p2035_p8, 1, 0 }
  0x15   : > { %p1665_p9 = pneg %p2035_p8  ;;  %s221_s10 = sshll.u32 %s1941_s9, 4  ;;  %s222_s10 = int_to_ptr.vmem [resolvable:$true] %s221_s10 }
  0x16   : > { %p1766_p13 = scmp.ne.s32.totalorder %s206_s7, %s1765_s11  ;;  %p1773_p5 = scmp.lt.s32.totalorder %s206_s7, %s206_s7 }
  0x17   : > { %p2044_p11 = pnand %p1665_p9, %p2319_p1  ;;  %p1774_p7 = scmp.lt.s32.totalorder %s1765_s11, %s1765_s11 }
  0x19   : > { %p1756_p12 = pneg %p2044_p11  ;;  %p1775_p10 = por %p1774_p7, %p1773_p5 }
  0x1b   : > { %p1768_p0 = pnand %p1766_p13, %p1756_p12 }
  0x1d   : > { %p1769_p3 = pneg %p1768_p0 }
  0x1f   : > { %p1776_p9 = pnand %p1775_p10, %p1769_p3 }
  0x21   : > { %1779 = shalt.err (!%p1776_p9)
}
  0x22   : > { %s1942_s12 = smov 128   ;;  %s1943_s13 = smov 8  }
  0x23   : > { %s2329_s2 = sld [smem:[#allocation17_spill]]  ;;  %s1791_s16 = scalar_lea.vmem %s222_s10, 512 }
  0x24   : > { %p1792_p1 = scmp.ne.s32.totalorder %s222_s10, %s1791_s16  ;;  %p1799_p2 = scmp.lt.s32.totalorder %s222_s10, %s222_s10 }
  0x25   : > { %p1800_p6 = scmp.lt.s32.totalorder %s1791_s16, %s1791_s16 }
  0x26   : > { %p1794_p13 = pnand %p1792_p1, %p1756_p12 }
  0x27   : > { %p1801_p5 = por %p1800_p6, %p1799_p2 }
  0x28   : > { %p1795_p0 = pneg %p1794_p13 }
  0x29   : > { %1668 = dma.hbm_to_vmem [thread:$0]  (!%p2044_p11), %s2329_s2, 512, %s206_s7, [#allocation6], %s1942_s12, %s1942_s12, %s1943_s13  }
  0x2a   : > { %p1802_p10 = pnand %p1801_p5, %p1795_p0 }
  0x2c   : > { %1805 = shalt.err (!%p1802_p10)
}
  0x2d   : > { %s2330_s4 = sld [smem:[#allocation18_spill]]  ;;  %s2067_s19 = sadd.s32 1, %s1938_s24  }
  0x2e   : > { %s33_s20 = sadd.s32 1, %s1934_s23  ;;  %s30_s26 = ssub.s32 %s1938_s24, %s2067_s19 }
  0x2f   : > { %p40_p1 = scmp.ne.s32.totalorder %s1934_s23, %s1930_s22  ;;  %p31_p2 = scmp.eq.s32.totalorder %s30_s26, 0 }
  0x30   : > { %p41_p6 = scmp.eq.s32.totalorder %s1938_s24, 0  ;;  %p2331_p12 = scmp.eq.s32.totalorder %s2016_s25, 1 }
  0x31   : > { %p1685_p7 = scmp.lt.s32.totalorder %s1938_s24, 2  ;;  %s238_s8 = sand.u32 1, %s1934_s23  }
  0x32   : > { %p2077_p3 = por %p2331_p12, %p40_p1  ;;  %p42_p9 = por %p41_p6, %p40_p1 }
  0x33   : > { %1671 = dma.hbm_to_vmem [thread:$0]  (!%p2044_p11), %s2330_s4, 512, %s222_s10, [#allocation9], %s1942_s12, %s1942_s12, %s1943_s13  }
  0x34   : > { %s2332_s30 = scalar_select %p2077_p3, 1, 0 }
  0x35   : > { %s2083_s7 = scalar_select %p31_p2, %s1934_s23, %s33_s20  }
  0x36   : > { %s2086_s9 = sshll.u32 %s238_s8, 3  ;;  %s1519_s10 = sshll.u32 %s1938_s24, 7 }
  0x37   : > { %2333 = sst [smem:[#allocation16_spill]] %s2083_s7  ;;  %s2092_s13 = scalar_lea.hbm %s2312_s0, %s1519_s10 }
  0x38   : > { %s242_s14 = scalar_lea.vmem [#allocation2], %s2086_s9  ;;  %p2097_p11 = pnand %p1685_p7, %p42_p9 }
  0x39   : > { %s249_s15 = sshll.u32 %s242_s14, 4  ;;  %s2104_s20 = scalar_lea.hbm %s2313_s1, %s1519_s10  ;;  %s2095_s15 = int_to_ptr.vmem [resolvable:$true] %s249_s15 }
  0x3a   : > { %s256_s26 = sand.u32 1, %s1938_s24   ;;  %s239_s11 = scalar_lea.sflag [#allocation3], %s238_s8 }
  0x3b   : > { %s1806_s12 = scalar_lea.hbm %s2092_s13, 128  ;;  %p1808_p0 = pneg %p2097_p11 }
  0x3c   : > { %p1807_p13 = scmp.ne.s32.totalorder %s2092_s13, %s1806_s12  ;;  %s1811_s4 = scalar_lea.hbm %s2312_s0, 256 }
  0x3d   : > { %p1812_p1 = scmp.lt.s32.totalorder %s2092_s13, %s2312_s0  ;;  %p1813_p2 = scmp.lt.s32.totalorder %s1811_s4, %s1806_s12 }
  0x3e   : > { %p1809_p5 = pnand %p1808_p0, %p1807_p13 }
  0x3f   : > { %p1814_p6 = por %p1813_p2, %p1812_p1 }
  0x40   : > { %p1810_p10 = pneg %p1809_p5 }
  0x42   : > { %p1815_p12 = pnand %p1814_p6, %p1810_p10 }
  0x44   : > { %1818 = shalt.err (!%p1815_p12)
}
  0x45   : > { %s1819_s8 = scalar_lea.vmem %s2095_s15, 128  ;;  %s1944_s2 = smov [#allocation2]  }
  0x46   : > { %p1820_p7 = scmp.ne.s32.totalorder %s2095_s15, %s1819_s8  ;;  %s1824_s10 = sshll.u32 %s1944_s2, 4  ;;  %s1825_s10 = int_to_ptr.vmem [resolvable:$false] %s1824_s10 }
  0x47   : > { %s1826_s18 = scalar_lea.vmem %s1825_s10, 256  ;;  %p1827_p5 = scmp.lt.s32.totalorder %s2095_s15, %s1825_s10 }
  0x48   : > { %p1822_p9 = pnand %p1820_p7, %p1808_p0  ;;  %p1828_p3 = scmp.lt.s32.totalorder %s1826_s18, %s1819_s8 }
  0x4a   : > { %p1823_p13 = pneg %p1822_p9  ;;  %p1829_p4 = por %p1828_p3, %p1827_p5 }
  0x4c   : > { %p1830_p1 = pnand %p1829_p4, %p1823_p13 }
  0x4e   : > { %1833 = shalt.err (!%p1830_p1)
}
  0x4f   : > { %1675 = dma.hbm_to_vmem [thread:$0]  (!%p2097_p11), %s2092_s13, 128, %s2095_s15, %s239_s11  }
  0x50   : > { %s260_s4 = scalar_lea.vmem [#allocation5], %s2086_s9  ;;  %s257_s12 = scalar_lea.sflag [#allocation6], %s256_s26 }
  0x51   : > { %s267_s7 = sshll.u32 %s260_s4, 4  ;;  %s1834_s14 = scalar_lea.hbm %s2104_s20, 128  ;;  %s268_s7 = int_to_ptr.vmem [resolvable:$true] %s267_s7 }
  0x52   : > { %p1835_p3 = scmp.ne.s32.totalorder %s2104_s20, %s1834_s14  ;;  %s1839_s2 = scalar_lea.hbm %s2313_s1, 256 }
  0x53   : > { %p1840_p2 = scmp.lt.s32.totalorder %s2104_s20, %s2313_s1  ;;  %p1841_p6 = scmp.lt.s32.totalorder %s1839_s2, %s1834_s14 }
  0x54   : > { %p1837_p4 = pnand %p1835_p3, %p1808_p0 }
  0x55   : > { %p1842_p12 = por %p1841_p6, %p1840_p2 }
  0x56   : > { %p1838_p10 = pneg %p1837_p4 }
  0x58   : > { %p1843_p7 = pnand %p1842_p12, %p1838_p10 }
  0x5a   : > { %1846 = shalt.err (!%p1843_p7)
}
  0x5b   : > { %s1847_s9 = scalar_lea.vmem %s268_s7, 128  ;;  %s1945_s13 = smov [#allocation5]  }
  0x5c   : > { %p1848_p9 = scmp.ne.s32.totalorder %s268_s7, %s1847_s9  ;;  %s1852_s15 = sshll.u32 %s1945_s13, 4  ;;  %s1853_s15 = int_to_ptr.vmem [resolvable:$false] %s1852_s15 }
  0x5d   : > { %s1854_s26 = scalar_lea.vmem %s1853_s15, 256  ;;  %p1855_p1 = scmp.lt.s32.totalorder %s268_s7, %s1853_s15 }
  0x5e   : > { %p1850_p13 = pnand %p1848_p9, %p1808_p0  ;;  %p1856_p3 = scmp.lt.s32.totalorder %s1854_s26, %s1847_s9 }
  0x60   : > { %p1851_p5 = pneg %p1850_p13  ;;  %p1857_p4 = por %p1856_p3, %p1855_p1 }
  0x62   : > { %p1858_p8 = pnand %p1857_p4, %p1851_p5 }
  0x64   : > { %1861 = shalt.err (!%p1858_p8)
}
  0x65   : > { %1678 = dma.hbm_to_vmem [thread:$0]  (!%p2097_p11), %s2104_s20, 128, %s268_s7, %s257_s12  }
  0x66   : > { %p2335_p10 = scmp.ne.s32.totalorder %s2327_s29, 0 }
  0x67   : > { %s2155_s11 = sand.u32 (!%p2335_p10), 1, %s1930_s22   ;;  %p2336_p0 = scmp.ne.s32.totalorder (!%p2335_p10), %s2325_s27, 0 }
  0x68   : > { %276 = sbr.rel (%p2335_p10) target bundleno = 2571 (0xa0b), region = 44  ;;  %s2158_s4 = sshll.u32 (!%p2335_p10), %s2155_s11, 3 }
  0x69   : > { %s279_s14 = scalar_lea.sflag (!%p2335_p10), [#allocation3], %s2155_s11  ;;  %s282_s17 = scalar_lea.vmem (!%p2335_p10), [#allocation2], %s2158_s4 }
  0x6d   : > { %1905 = dma.done.wait (%p2336_p0), %s279_s14, 128  }
  0x6e   : > { %1907 = vsyncadd (%p2336_p0), %s279_s14, 4294967168  ;;  %s287_s29 = sand.u32 1, %s2016_s25   ;;  %s291_s20 = scalar_lea.vmem [#allocation5], %s2158_s4 }
  0x6f   : > { %s288_s16 = scalar_lea.sflag [#allocation6], %s287_s29 }
  0x70   : > { %1909 = dma.done.wait (%p2336_p0), %s288_s16, 128  }
  0x71   : > { %1911 = vsyncadd (%p2336_p0), %s288_s16, 4294967168  ;;  %p2337_p8 = scmp.eq.s32.totalorder %s2016_s25, 0 }
  0x73   : > { %1913 = dma.done.wait (%p2337_p8), [#allocation6], 512   ;;  %p2338_p11 = pmov %p2337_p8 }
  0x74   : > { %p2339_p2 = pmov %p2337_p8 }
  0x75   : > { %1915 = vsyncadd (%p2338_p11), [#allocation6], 4294966784 }
  0x76   : > { %1917 = dma.done.wait (%p2339_p2), [#allocation9], 512   ;;  %p2340_p6 = pmov %p2339_p2 }
  0x77   : > { %v1946_v0 = vmov 0.0   ;;  %vm1947_vm0 = vmmov 0   ;;  %v337_v1 = vld [vmem:[#allocation7 + $0x18] sm:$0xff]  ;;  %v336_v2 = vld [vmem:[#allocation7 + $0x10] sm:$0xff]  ;;  %v335_v3 = vld [vmem:[#allocation7 + $0x8] sm:$0xff]  ;;  %vm345_vm1 = vcmask 261120  }
  0x78   : > { %1919 = vsyncadd (%p2340_p6), [#allocation9], 4294966784  ;;  %1580 = vmatprep.subr.mxu0 %v1946_v0  ;;  %1588 = vmatprep.mubr.msk.f32.mxu0 %vm1947_vm0, %v1946_v0  ;;  %v334_v4 = vld [vmem:[#allocation7] sm:$0xff]  ;;  %s1948_s12 = smov 120   ;;  %s1949_s8 = smov 96   ;;  %vm428_vm2 = vcmask 64512  }
  0x79   : > { %1591 = vmatprep.subr.mxu1 %v1946_v0  ;;  %1593 = vmatprep.mubr.msk.f32.mxu1 %vm1947_vm0, %v1946_v0  ;;  %v333_v5 = vld [vmem:[%s282_s17] sm:$0xff]  ;;  %s1950_s2 = smov 88   ;;  %v2214_v13 = vld [vmem:[%s291_s20] sm:$0xff]  ;;  %s1951_s10 = smov 56  }
  0x7a   : > { %1581 = vmatpush3.msra.mxu0 %v337_v1  ;;  %v1528_v6 = vld [vmem:[%s2315_s3] ss:$0 sm:$0xff]  ;;  %s1952_s18 = smov 64   ;;  %s1953_s9 = smov 80   ;;  %v420_v41 = vld [vmem:[#allocation8 + $0x8] sm:$0xff] }
  0x7b   : > { %1582 = vmatprep.subr.mxu0 %v1946_v0  ;;  %s1954_s13 = smov 112   ;;  %v419_v40 = vld [vmem:[#allocation8] sm:$0xff]  ;;  %s1955_s15 = smov 72  }
  0x7c   : > { %1583 = vmatpush3.msra.mxu0 %v336_v2  ;;  %s1956_s26 = smov 104   ;;  %s1957_s14 = smov 48  }
  0x7d   : > { %1584 = vmatprep.subr.mxu0 %v1946_v0  ;;  %s1958_s17 = smov 40   ;;  %s1548_s20 = sshll.u32 %s2016_s25, 7 }
  0x7e   : > { %1585 = vmatpush3.msra.mxu0 %v335_v3  ;;  %s332_s27 = scalar_lea.vmem [#allocation10], %s2158_s4  ;;  %p2341_p7 = scmp.ne.s32.totalorder %s2332_s30, 0 }
  0x7f   : > { %1586 = vmatprep.subr.mxu0 %v1946_v0  ;;  %s1401_s7 = sshll.u32 %s332_s27, 4  ;;  %s1402_s7 = int_to_ptr.vmem [resolvable:$true] %s1401_s7 }
  0x80   : > { %1587 = vmatpush3.msra.mxu0 %v334_v4 }
  0x81   : > { %1589 = vmatmul.mubr.msk.f32.vlgmr.msra.gmra.mxu0 %vm345_vm1, %v333_v5  ;;  %1601 = vmatprep.subr.mxu0 %v1946_v0  ;;  %v421_v5 = vld [vmem:[#allocation8 + $0x10] sm:$0xff] }
  0x82   : > { %1603 = vmatprep.mubr.msk.f32.mxu0 %vm1947_vm0, %v1946_v0 }
 0x141   : > { %v415_v7 = vpop.f32.mrf.mxu0 }
 0x142   : > { %v2196_v8 = vadd.f32 %v1528_v6, %v415_v7 }
 0x143   : > { %v1590_v9 = vpop.f32.mrf.mxu0 }
 0x144   : > { %590 = vrot.lane.b32.xlu1 %v2196_v8, %s1948_s12  ;;  %426 = vrot.lane.b32.xlu0 %v2196_v8, %s1949_s8 }
 0x148   : > { %592 = vrot.lane.b32.xlu0 %v2196_v8, %s1950_s2  ;;  %s1399_s2 = scalar_lea.hbm %s2318_s6, %s1548_s20 }
 0x1b6   : > { %v427_v10 = vpop.permute.xlu0 %426  ;;  %v591_v12 = vpop.permute.xlu1 %590 }
 0x1b7   : > { %1592 = vmatpush3.xpose.msk.msra.mxu1 %vm428_vm2, %v427_v10 }
 0x1b8   : > { %1596 = vmatprep.subr.mxu1 %v1946_v0 }
 0x1ba   : > { %1594 = vmatmul.mubr.msk.f32.vlgmr.msra.gmra.mxu1 %vm428_vm2, %v2196_v8  ;;  %v593_v11 = vpop.permute.xlu0 %592 }
 0x1bb   : > { %1602 = vmatpush3.xpose.msk.msra.mxu0 %vm428_vm2, %v593_v11  ;;  %1598 = vmatprep.mubr.msk.f32.mxu1 %vm1947_vm0, %v1946_v0 }
 0x1bc   : > { %1611 = vmatprep.subr.mxu0 %v1946_v0 }
 0x1be   : > { %1604 = vmatmul.mubr.msk.f32.vlgmr.msra.gmra.mxu0 %vm428_vm2, %v591_v12 }
 0x1bf   : > { %1613 = vmatprep.mubr.msk.f32.mxu0 %vm1947_vm0, %v1946_v0  ;;  %1612 = vmatpush3.msra.mxu0 %v420_v41 }
 0x1c0   : > { %1621 = vmatprep.subr.mxu0 %v1946_v0 }
 0x27a   : > { %v499_v14 = vpop.f32.mrf.mxu1 }
 0x27b   : > { %v500_v15 = vadd.f32 %v499_v14, %v2214_v13 }
 0x27c   : > { %v1595_v16 = vpop.f32.mrf.mxu1 }
 0x27d   : > { %v503_v17 = vsel %vm428_vm2, %v500_v15, -inf }
 0x27e   : > { %504 = vmax.xlane.f32.xlu1 %v503_v17  ;;  %v664_v18 = vpop.f32.mrf.mxu0 }
 0x27f   : > { %v665_v19 = vadd.f32 %v664_v18, %v2214_v13 }
 0x280   : > { %v1605_v20 = vpop.f32.mrf.mxu0 }
 0x281   : > { %v668_v21 = vsel %vm428_vm2, %v665_v19, -inf }
 0x282   : > { %669 = vmax.xlane.f32.xlu0 %v668_v21 }
 0x307   : > { %v505_v22 = vpop.xlane.xlu1 %504 }
 0x308   : > { %v506_v23 = vsub.f32 %v500_v15, %v505_v22 }
 0x30a   : > { %v507_v24 = vmul.f32 1.442695, %v506_v23 }
 0x30b   : > { %v670_v25 = vpop.xlane.xlu0 %669 }
 0x30c   : > { %1738 = vpow2.f32 %v507_v24  ;;  %v671_v26 = vsub.f32 %v665_v19, %v670_v25 }
 0x30e   : > { %v672_v27 = vmul.f32 1.442695, %v671_v26  ;;  %v1546_v26 = vld [vmem:[%s2317_s5] ss:$0 sm:$0xff] }
 0x310   : > { %1740 = vpow2.f32 %v672_v27 }
 0x319   : > { %v1739_v28 = vpop.eup %1738 }
 0x31a   : > { %v509_v29 = vsel %vm428_vm2, %v1739_v28, 0.0 }
 0x31b   : > { %510 = vadd.xlane.f32.xlu0 %v509_v29 }
 0x31d   : > { %v1741_v30 = vpop.eup %1740 }
 0x31e   : > { %v674_v31 = vsel %vm428_vm2, %v1741_v30, 0.0 }
 0x31f   : > { %675 = vadd.xlane.f32.xlu1 %v674_v31 }
 0x330   : > { %679 = vrot.lane.b32.xlu1 %v2196_v8, %s1951_s10  ;;  %s1388_s10 = scalar_lea.sflag [#allocation4], %s2155_s11 }
 0x331   : > { %514 = vrot.lane.b32.xlu0 %v2196_v8, %s1952_s18  ;;  %s1862_s18 = scalar_lea.vmem %s1402_s7, 128 }
 0x332   : > { %p1863_p12 = scmp.ne.s32.totalorder %s1402_s7, %s1862_s18 }
 0x334   : > { %903 = vrot.lane.b32.xlu1 %v2196_v8, %s1953_s9  ;;  %p1864_p9 = pnand %p1863_p12, %p2341_p7  ;;  %s1959_s9 = smov [#allocation10]  }
 0x335   : > { %901 = vrot.lane.b32.xlu0 %v2196_v8, %s1954_s13  ;;  %s1866_s25 = sshll.u32 %s1959_s9, 4  ;;  %s1867_s25 = int_to_ptr.vmem [resolvable:$false] %s1866_s25 }
 0x336   : > { %p1865_p13 = pneg %p1864_p9  ;;  %s1868_s4 = scalar_lea.vmem %s1867_s25, 256 }
 0x337   : > { %p1869_p5 = scmp.lt.s32.totalorder %s1402_s7, %s1867_s25  ;;  %p1870_p1 = scmp.lt.s32.totalorder %s1868_s4, %s1862_s18 }
 0x339   : > { %p1871_p3 = por %p1870_p1, %p1869_p5 }
 0x33b   : > { %p1872_p4 = pnand %p1871_p3, %p1865_p13 }
 0x3a4   : > { %v511_v32 = vpop.xlane.xlu0 %510 }
 0x3a5   : > { %1742 = vrcp.f32 %v511_v32 }
 0x3a8   : > { %v676_v33 = vpop.xlane.xlu1 %675  ;;  %v515_v34 = vpop.permute.xlu0 %514 }
 0x3a9   : > { %1744 = vrcp.f32 %v676_v33  ;;  %1597 = vmatpush3.msra.mxu1 %v515_v34 }
 0x3aa   : > { %1606 = vmatprep.subr.mxu1 %v1946_v0 }
 0x3ac   : > { %v680_v37 = vpop.permute.xlu1 %679  ;;  %v902_v47 = vpop.permute.xlu0 %901 }
 0x3b0   : > { %v904_v45 = vpop.permute.xlu1 %903 }
 0x3b2   : > { %v1743_v35 = vpop.eup %1742 }
 0x3b3   : > { %v513_v36 = vmul.f32 %v1743_v35, %v1739_v28 }
 0x3b5   : > { %1599 = vmatmul.mubr.msk.f32.vlgmr.msra.gmra.mxu1 %vm428_vm2, %v513_v36 }
 0x3b6   : > { %v1745_v38 = vpop.eup %1744  ;;  %1607 = vmatpush3.msra.mxu1 %v680_v37  ;;  %1608 = vmatprep.mubr.msk.f32.mxu1 %vm1947_vm0, %v1946_v0 }
 0x3b7   : > { %v678_v39 = vmul.f32 %v1745_v38, %v1741_v30  ;;  %1616 = vmatprep.subr.mxu1 %v1946_v0 }
 0x3b9   : > { %1609 = vmatmul.mubr.msk.f32.vlgmr.msra.gmra.mxu1 %vm428_vm2, %v678_v39 }
 0x3ba   : > { %1618 = vmatprep.mubr.msk.f32.mxu1 %vm1947_vm0, %v1946_v0  ;;  %1617 = vmatpush3.msra.mxu1 %v419_v40 }
 0x3bb   : > { %1626 = vmatprep.subr.mxu1 %v1946_v0 }
 0x475   : > { %v586_v42 = vpop.f32.mrf.mxu1 }
 0x476   : > { %1619 = vmatmul.mubr.msk.f32.vlgmr.msra.gmra.mxu1 %vm428_vm2, %v586_v42 }
 0x477   : > { %v1600_v43 = vpop.f32.mrf.mxu1  ;;  %1628 = vmatprep.mubr.msk.f32.mxu1 %vm1947_vm0, %v1946_v0 }
 0x479   : > { %v751_v44 = vpop.f32.mrf.mxu1 }
 0x47a   : > { %1614 = vmatmul.mubr.msk.f32.vlgmr.msra.gmra.mxu0 %vm428_vm2, %v751_v44 }
 0x47b   : > { %1622 = vmatpush3.xpose.msk.msra.mxu0 %vm428_vm2, %v904_v45  ;;  %v1610_v46 = vpop.f32.mrf.mxu1  ;;  %1623 = vmatprep.mubr.msk.f32.mxu0 %vm1947_vm0, %v1946_v0 }
 0x47c   : > { %1631 = vmatprep.subr.mxu0 %v1946_v0 }
 0x47e   : > { %1624 = vmatmul.mubr.msk.f32.vlgmr.msra.gmra.mxu0 %vm428_vm2, %v902_v47 }
 0x47f   : > { %1633 = vmatprep.mubr.msk.f32.mxu0 %vm1947_vm0, %v1946_v0  ;;  %1632 = vmatpush3.msra.mxu0 %v421_v5 }
 0x480   : > { %1641 = vmatprep.subr.mxu0 %v1946_v0 }
 0x536   : > { %v897_v48 = vpop.f32.mrf.mxu1 }
 0x538   : > { %v1620_v49 = vpop.f32.mrf.mxu1 }
 0x53a   : > { %v824_v50 = vpop.f32.mrf.mxu0 }
 0x53b   : > { %v898_v51 = vadd.f32 %v897_v48, %v824_v50 }
 0x53c   : > { %v1615_v52 = vpop.f32.mrf.mxu0 }
 0x53e   : > { %v975_v53 = vpop.f32.mrf.mxu0 }
 0x53f   : > { %v976_v54 = vadd.f32 %v975_v53, %v2214_v13 }
 0x540   : > { %v1625_v55 = vpop.f32.mrf.mxu0 }
 0x541   : > { %v979_v56 = vsel %vm428_vm2, %v976_v54, -inf }
 0x542   : > { %980 = vmax.xlane.f32.xlu1 %v979_v56 }
 0x553   : > { %1142 = vrot.lane.b32.xlu1 %v2196_v8, %s1955_s15 }
 0x557   : > { %1140 = vrot.lane.b32.xlu1 %v2196_v8, %s1956_s26 }
 0x5cb   : > { %v981_v57 = vpop.xlane.xlu1 %980 }
 0x5cc   : > { %v982_v58 = vsub.f32 %v976_v54, %v981_v57 }
 0x5ce   : > { %v983_v59 = vmul.f32 1.442695, %v982_v58 }
 0x5cf   : > { %v1143_v2 = vpop.permute.xlu1 %1142 }
 0x5d0   : > { %1746 = vpow2.f32 %v983_v59 }
 0x5d3   : > { %v1141_v4 = vpop.permute.xlu1 %1140 }
 0x5dd   : > { %v1747_v60 = vpop.eup %1746 }
 0x5de   : > { %v985_v61 = vsel %vm428_vm2, %v1747_v60, 0.0 }
 0x5df   : > { %986 = vadd.xlane.f32.xlu0 %v985_v61 }
 0x5f5   : > { %990 = vrot.lane.b32.xlu0 %v2196_v8, %s1957_s14 }
 0x668   : > { %v987_v62 = vpop.xlane.xlu0 %986 }
 0x669   : > { %1748 = vrcp.f32 %v987_v62 }
 0x66c   : > { %v991_v63 = vpop.permute.xlu0 %990 }
 0x66d   : > { %1627 = vmatpush3.msra.mxu1 %v991_v63 }
 0x66e   : > { %1636 = vmatprep.subr.mxu1 %v1946_v0 }
 0x676   : > { %v1749_v1 = vpop.eup %1748 }
 0x677   : > { %v989_v3 = vmul.f32 %v1749_v1, %v1747_v60 }
 0x679   : > { %1629 = vmatmul.mubr.msk.f32.vlgmr.msra.gmra.mxu1 %vm428_vm2, %v989_v3 }
 0x67a   : > { %1637 = vmatpush3.xpose.msk.msra.mxu1 %vm428_vm2, %v1143_v2  ;;  %1638 = vmatprep.mubr.msk.f32.mxu1 %vm1947_vm0, %v1946_v0 }
 0x67b   : > { %1646 = vmatprep.subr.mxu1 %v1946_v0 }
 0x67d   : > { %1639 = vmatmul.mubr.msk.f32.vlgmr.msra.gmra.mxu1 %vm428_vm2, %v1141_v4 }
 0x67e   : > { %1648 = vmatprep.mubr.msk.f32.mxu1 %vm1947_vm0, %v1946_v0 }
 0x739   : > { %v1062_v6 = vpop.f32.mrf.mxu1 }
 0x73a   : > { %1634 = vmatmul.mubr.msk.f32.vlgmr.msra.gmra.mxu0 %vm428_vm2, %v1062_v6 }
 0x73b   : > { %v1630_v7 = vpop.f32.mrf.mxu1  ;;  %1643 = vmatprep.mubr.msk.f32.mxu0 %vm1947_vm0, %v1946_v0  ;;  %v422_v0 = vld [vmem:[#allocation8 + $0x18] sm:$0xff] }
 0x73c   : > { %1647 = vmatpush3.msra.mxu1 %v422_v0 }
 0x73d   : > { %v1214_v9 = vpop.f32.mrf.mxu1 }
 0x73e   : > { %v1215_v10 = vadd.f32 %v1214_v9, %v2214_v13 }
 0x73f   : > { %v1640_v11 = vpop.f32.mrf.mxu1 }
 0x740   : > { %v1218_v12 = vsel %vm428_vm2, %v1215_v10, -inf }
 0x741   : > { %1219 = vmax.xlane.f32.xlu0 %v1218_v12 }
 0x757   : > { %1229 = vrot.lane.b32.xlu0 %v2196_v8, %s1958_s17 }
 0x7ca   : > { %v1220_v14 = vpop.xlane.xlu0 %1219 }
 0x7cb   : > { %v1221_v15 = vsub.f32 %v1215_v10, %v1220_v14 }
 0x7cd   : > { %v1222_v16 = vmul.f32 1.442695, %v1221_v15 }
 0x7ce   : > { %v1230_v17 = vpop.permute.xlu0 %1229 }
 0x7cf   : > { %1750 = vpow2.f32 %v1222_v16  ;;  %1642 = vmatpush3.msra.mxu0 %v1230_v17 }
 0x7dc   : > { %v1751_v18 = vpop.eup %1750 }
 0x7dd   : > { %v1224_v19 = vsel %vm428_vm2, %v1751_v18, 0.0 }
 0x7de   : > { %1225 = vadd.xlane.f32.xlu1 %v1224_v19 }
 0x7fa   : > { %v1135_v13 = vpop.f32.mrf.mxu0 }
 0x7fb   : > { %v1139_v20 = vadd.f32 %v1135_v13, %v898_v51 }
 0x7fc   : > { %v1635_v21 = vpop.f32.mrf.mxu0 }
 0x867   : > { %v1226_v22 = vpop.xlane.xlu1 %1225 }
 0x868   : > { %1752 = vrcp.f32 %v1226_v22 }
 0x875   : > { %v1753_v8 = vpop.eup %1752 }
 0x876   : > { %v1228_v23 = vmul.f32 %v1753_v8, %v1751_v18 }
 0x878   : > { %1644 = vmatmul.mubr.msk.f32.vlgmr.msra.gmra.mxu0 %vm428_vm2, %v1228_v23 }
 0x938   : > { %v1301_v24 = vpop.f32.mrf.mxu0 }
 0x939   : > { %1649 = vmatmul.mubr.msk.f32.vlgmr.msra.gmra.mxu1 %vm428_vm2, %v1301_v24 }
 0x93a   : > { %v1645_v25 = vpop.f32.mrf.mxu0 }
 0x9f9   : > { %v1374_v27 = vpop.f32.mrf.mxu1 }
 0x9fa   : > { %v1378_v28 = vadd.f32 %v1374_v27, %v1139_v20 }
 0x9fb   : > { %v1650_v29 = vpop.f32.mrf.mxu1 }
 0x9fc   : > { %v1385_v30 = vadd.f32 %v1546_v26, %v1378_v28 }
 0x9fe   : > { %1386 = vst.msk [vmem:[%s332_s27] sm:$0xff] %vm345_vm1, %v1385_v30 }
 0x9ff   : > { %1875 = shalt.err (!%p1872_p4)
}
 0xa00   : > { %s1876_s13 = scalar_lea.hbm %s1399_s2, 128  ;;  %s1880_s26 = scalar_lea.hbm %s2318_s6, 256 }
 0xa01   : > { %p1877_p10 = scmp.ne.s32.totalorder %s1399_s2, %s1876_s13  ;;  %p1881_p11 = scmp.lt.s32.totalorder %s1399_s2, %s2318_s6 }
 0xa02   : > { %p1882_p2 = scmp.lt.s32.totalorder %s1880_s26, %s1876_s13 }
 0xa03   : > { %p1878_p0 = pnand %p1877_p10, %p2341_p7 }
 0xa04   : > { %p1883_p6 = por %p1882_p2, %p1881_p11 }
 0xa05   : > { %p1879_p8 = pneg %p1878_p0 }
 0xa07   : > { %p1884_p12 = pnand %p1883_p6, %p1879_p8 }
 0xa09   : > { %1887 = shalt.err (!%p1884_p12)
}
 0xa0a   : > { %1663 = dma.vmem_to_hbm [thread:$0]  (%p2341_p7), %s1402_s7, 128, %s1399_s2, %s1388_s10  }
 0xa0b PF: > { %s1413_s29 = sand.u32 1, %s1926_s21   ;;  %p2342_p9 = scmp.ne.s32.totalorder %s2326_s28, 0 }
 0xa0c   : > { %p2343_p13 = scmp.ge.s32.totalorder %s1938_s24, 2  ;;  %s1414_s16 = scalar_lea.sflag [#allocation4], %s1413_s29 }
 0xa0e   : > { %p1680_p5 = pnand %p2343_p13, %p2342_p9 }
 0xa10   : > { %p1681_p1 = pneg %p1680_p5 }
 0xa12   : > { %1921 = dma.done.wait (%p1681_p1), %s1414_s16, 128  }
 0xa13   : > { %1923 = vsyncadd (%p1681_p1), %s1414_s16, 4294967168  ;;  %s2344_s20 = sld [smem:[#allocation16_spill]]  ;;  %p23_p3 = scmp.ge.s32.totalorder %s2067_s19, 4  }
 0xa14   : > { %s2345_s21 = smov %s1930_s22  ;;  %s2346_s22 = smov %s1934_s23 }
 0xa15   : > { %s2348_s24 = smov %s2067_s19  ;;  %25 = sbr.rel (!%p23_p3) target bundleno = 11 (0xb), region = 110 }
 0xa19   : > { %s2347_s23 = smov %s2344_s20 }
 0xa1a   :  { %1419 = vsyncpa [#allocation3], 1 }
 0xa1b   :  { %1421 = vsyncpa [#allocation3 + $0x1], 1 }
 0xa1c   :  { %1422 = vsyncpa [#allocation6], 1 }
 0xa1d   :  { %1424 = vsyncpa [#allocation6 + $0x1], 1 }
 0xa1e   :  { %1425 = vsyncpa [#allocation9], 1 }
 0xa1f   :  { %1426 = vsyncpa [#allocation4], 1 }
 0xa20   :  { %1428 = vsyncpa [#allocation4 + $0x1], 1 }

</bundles_post_ra>
